<compile_context>
chip_gen: v7x
topology: tpu7x:2x2x1
jax: 0.10.0
libtpu: 0.0.40
codegen_flags: <defaults>
</compile_context>

<pallas_src>
import functools

import jax
import jax.numpy as jnp
import numpy as np
from jax.experimental import pallas as pl
from jax.experimental.pallas import tpu as pltpu


def _round_up(a: int, b: int) -> int:
    return (a + b - 1) // b * b


def _device_budget():
    """Return (scoped VMEM budget in bytes, multi-TensorCore chip?)."""
    vmem_cap = 64 << 20                       # conservative (v7x-class) default
    try:
        vmem_cap = int(getattr(pltpu.get_tpu_info(), "vmem_capacity_bytes",
                               vmem_cap))
    except Exception:
        pass
    multi_tc = False
    try:
        kind = jax.devices()[0].device_kind.lower()
        multi_tc = any(tag in kind for tag in ("v7", "v4", "v5p"))
    except Exception:
        pass
    budget = min(vmem_cap * 3 // 4, 96 << 20)  # ~48 MiB on v7x, 96 MiB on v5e/v6e
    return budget, multi_tc


def _pick_batch_tile(batch: int, per_image_bytes: int, budget_bytes: int,
                     want_steps: int) -> int:
    """Largest divisor of `batch` whose (padded, double-buffered) blocks fit
    the VMEM budget while keeping at least `want_steps` grid steps."""
    best = 1
    for tb in range(1, batch + 1):
        if batch % tb:
            continue
        if tb * per_image_bytes > budget_bytes:
            break
        if batch >= want_steps and (batch // tb) < want_steps:
            continue
        best = tb
    return best


def _create_field_kernel(x_ref, w_ref, b_ref, m_ref, o_ref, *, W,
                         intensity_modulation, post_mult, field_multiplier):
    # x_ref : (TB, C_in, H*W)   lane-dense NC(HW) input block
    # w_ref : (9, C_out, C_in)  per-tap weight matrices (tap = ky*3 + kx)
    # b_ref : (C_out, 1)        bias
    # m_ref : (9, H*W)          per-tap halo-validity masks (0/1)
    # o_ref : (TB, C_out, H*W)  lane-dense NC(HW) output block
    TB, C_in, HW = x_ref.shape
    C_out = w_ref.shape[1]

    # Hoist the tiny loop-invariant operands out of the per-image loop.
    w_taps = [w_ref[tap] for tap in range(9)]              # (C_out, C_in)
    m_taps = [m_ref[tap:tap + 1, :] for tap in range(9)]   # (1, HW)
    bias = b_ref[...]                                       # (C_out, 1)

    def one_image(t, carry):
        x_img = x_ref[t]                                    # (C_in, HW)
        acc = jnp.zeros((C_out, HW), jnp.float32)
        for tap in range(9):                                # static 3x3 unroll
            dy, dx = tap // 3 - 1, tap % 3 - 1
            shift = dy * W + dx                             # flattened pixel offset
            # Channel contraction on the MXU first (pixel axis passes through),
            y_tap = jnp.dot(w_taps[tap], x_img,
                            preferred_element_type=jnp.float32)  # (C_out, HW)
            # then a cheap XLU lane-roll of the tiny result and a halo mask
            # (implements the conv's zero padding at the image border).
            if shift != 0:
                y_tap = pltpu.roll(y_tap, shift=(-shift) % HW, axis=1)
            acc = acc + y_tap * m_taps[tap]
        acc = acc + bias
        if intensity_modulation:
            # post_mult * (sigmoid(y) - 0.5) * field_multiplier, fused in-kernel.
            sig = pl.reciprocal(1.0 + jnp.exp(-acc), approx=True)
            acc = (post_mult * field_multiplier) * (sig - 0.5)
        o_ref[t] = acc.astype(o_ref.dtype)
        return carry

    jax.lax.fori_loop(0, TB, one_image, 0)


def create_field_forward(x, weight, bias, *,
                         intensity_modulation=False,
                         intensity_field_act='Sigmoid',
                         intensity_field_act_mult=3.0,
                         field_multiplier=1.0):
    """CreateField forward (nb_layers=1).

    x      : (B, C_in, H, W) float32, NCHW (like PyTorch)
    weight : (C_out, C_in, 3, 3) conv weight
    bias   : (C_out,)            conv bias
    Returns (B, C_out, H, W).
    """
    assert intensity_field_act == 'Sigmoid', \
        "only the default Sigmoid intensity_field_act is implemented"
    B, C_in, H, W = x.shape
    C_out = weight.shape[0]
    assert weight.shape == (C_out, C_in, 3, 3)
    assert bias.shape == (C_out,)
    HW = H * W

    # Keep NCHW; merge (H, W) -> HW (free contiguous reshape) so the minor dim
    # is lane-dense.  No transpose / pad HBM passes.
    x3 = x.astype(jnp.float32).reshape(B, C_in, HW)
    # per-tap (C_out, C_in) matrices; tap index = ky*3 + kx
    w_taps = jnp.transpose(weight.astype(jnp.float32), (2, 3, 0, 1)).reshape(
        9, C_out, C_in)
    b2 = bias.astype(jnp.float32).reshape(C_out, 1)

    # Static per-tap halo masks (conv zero padding), built at trace time.
    ii, jj = np.meshgrid(np.arange(H), np.arange(W), indexing='ij')
    masks = np.empty((9, HW), np.float32)
    for tap in range(9):
        dy, dx = tap // 3 - 1, tap % 3 - 1
        valid = (ii + dy >= 0) & (ii + dy < H) & (jj + dx >= 0) & (jj + dx < W)
        masks[tap] = valid.reshape(-1).astype(np.float32)
    masks = jnp.asarray(masks)

    # Generation-aware batch tiling: padded VMEM tiles x2 (double buffering);
    # only insist on >=2 grid steps on multi-TensorCore chips.
    vmem_budget, multi_tc = _device_budget()
    per_image_bytes = 2 * (_round_up(C_in, 8) + 8) * _round_up(HW, 128) * 4
    TB = _pick_batch_tile(
        B, per_image_bytes,
        budget_bytes=max(vmem_budget - (4 << 20), per_image_bytes),
        want_steps=2 if multi_tc else 1)

    kernel = functools.partial(
        _create_field_kernel, W=W,
        intensity_modulation=bool(intensity_modulation),
        post_mult=float(intensity_field_act_mult),
        field_multiplier=float(field_multiplier))

    out3 = pl.pallas_call(
        kernel,
        out_shape=jax.ShapeDtypeStruct((B, C_out, HW), jnp.float32),
        grid_spec=pltpu.PrefetchScalarGridSpec(
            num_scalar_prefetch=0,
            grid=(B // TB,),
            in_specs=[
                pl.BlockSpec((TB, C_in, HW), lambda n: (n, 0, 0)),    # activations
                pl.BlockSpec((9, C_out, C_in), lambda n: (0, 0, 0)),  # tap weights
                pl.BlockSpec((C_out, 1), lambda n: (0, 0)),           # bias
                pl.BlockSpec((9, HW), lambda n: (0, 0)),              # halo masks
            ],
            out_specs=pl.BlockSpec((TB, C_out, HW), lambda n: (n, 0, 0)),
        ),
        compiler_params=pltpu.CompilerParams(
            dimension_semantics=("parallel",),
            vmem_limit_bytes=int(vmem_budget)),
    )(x3, w_taps, b2, masks)

    # Free contiguous un-merge back to NCHW.
    return out3.reshape(B, C_out, H, W)


def _reference(x, weight, bias, intensity_modulation, post_mult, field_multiplier):
    """Pure-JAX reference matching the PyTorch module (full precision)."""
    y = jax.lax.conv_general_dilated(
        x.astype(jnp.float32), weight.astype(jnp.float32),
        window_strides=(1, 1), padding=((1, 1), (1, 1)),
        dimension_numbers=('NCHW', 'OIHW', 'NCHW'),
        precision=jax.lax.Precision.HIGHEST)
    y = y + bias.astype(jnp.float32).reshape(1, -1, 1, 1)
    if intensity_modulation:
        y = post_mult * (jax.nn.sigmoid(y) - 0.5) * field_multiplier
    return y


if __name__ == "__main__":
    key = jax.random.PRNGKey(0)
    kx, kw1, kb1, kw2, kb2 = jax.random.split(key, 5)

    B, dec_feats, H, W = 2, 32, 16, 16
    x = jax.random.normal(kx, (B, dec_feats, H, W), dtype=jnp.float32)

    # --- intensity-modulation head: dec_feats -> 1 channel, sigmoid tail ---
    w_im = 0.05 * jax.random.normal(kw1, (1, dec_feats, 3, 3), dtype=jnp.float32)
    b_im = 0.01 * jax.random.normal(kb1, (1,), dtype=jnp.float32)
    out_im = jax.block_until_ready(create_field_forward(
        x, w_im, b_im, intensity_modulation=True,
        intensity_field_act='Sigmoid', intensity_field_act_mult=3.0,
        field_multiplier=1.0))
    ref_im = _reference(x, w_im, b_im, True, 3.0, 1.0)
    # Default (non-HIGHEST) matmul precision + approx reciprocal -> loose tol.
    np.testing.assert_allclose(np.asarray(out_im), np.asarray(ref_im),
                               atol=5e-2, rtol=5e-2)

    # --- displacement-field head: dec_feats -> nb_dims(=2) channels, raw conv ---
    w_df = 0.05 * jax.random.normal(kw2, (2, dec_feats, 3, 3), dtype=jnp.float32)
    b_df = 0.01 * jax.random.normal(kb2, (2,), dtype=jnp.float32)
    out_df = jax.block_until_ready(create_field_forward(
        x, w_df, b_df, intensity_modulation=False))
    ref_df = _reference(x, w_df, b_df, False, 3.0, 1.0)
    np.testing.assert_allclose(np.asarray(out_df), np.asarray(ref_df),
                               atol=5e-2, rtol=5e-2)

    print("KERNEL_OK")
</pallas_src>

<mosaic_0001>
module attributes {stable_mosaic.version = 11 : i64} {
  func.func @_create_field_kernel(%arg0: i32, %arg1: memref<2x32x256xf32, #tpu.memory_space<vmem>>, %arg2: memref<9x1x32xf32, #tpu.memory_space<vmem>>, %arg3: memref<1x1xf32, #tpu.memory_space<vmem>>, %arg4: memref<9x256xf32, #tpu.memory_space<vmem>>, %arg5: memref<2x1x256xf32, #tpu.memory_space<vmem>>) attributes {dimension_semantics = [#tpu.dimension_semantics<parallel>], iteration_bounds = array<i64: 1>, scalar_prefetch = 0 : i64, scratch_operands = 0 : i64, tpu.core_type = #tpu.core_type<tc>, window_params = [{transform_indices = @transform_0, window_bounds = array<i64: 2, 32, 256>}, {pipeline_mode = #tpu.pipeline_mode<synchronous>, transform_indices = @transform_1, window_bounds = array<i64: 9, 1, 32>}, {pipeline_mode = #tpu.pipeline_mode<synchronous>, transform_indices = @transform_2, window_bounds = array<i64: 1, 1>}, {pipeline_mode = #tpu.pipeline_mode<synchronous>, transform_indices = @transform_3, window_bounds = array<i64: 9, 256>}, {transform_indices = @transform_4, window_bounds = array<i64: 2, 1, 256>}]} {
    %c0 = arith.constant 0 : index
    %c0_0 = arith.constant 0 : index
    %c0_1 = arith.constant 0 : index
    %0 = vector.load %arg2[%c0, %c0_0, %c0_1] : memref<9x1x32xf32, #tpu.memory_space<vmem>>, vector<1x1x32xf32>
    %1 = vector.shape_cast %0 : vector<1x1x32xf32> to vector<1x32xf32>
    %c1 = arith.constant 1 : index
    %c0_2 = arith.constant 0 : index
    %c0_3 = arith.constant 0 : index
    %2 = vector.load %arg2[%c1, %c0_2, %c0_3] : memref<9x1x32xf32, #tpu.memory_space<vmem>>, vector<1x1x32xf32>
    %3 = vector.shape_cast %2 : vector<1x1x32xf32> to vector<1x32xf32>
    %c2 = arith.constant 2 : index
    %c0_4 = arith.constant 0 : index
    %c0_5 = arith.constant 0 : index
    %4 = vector.load %arg2[%c2, %c0_4, %c0_5] : memref<9x1x32xf32, #tpu.memory_space<vmem>>, vector<1x1x32xf32>
    %5 = vector.shape_cast %4 : vector<1x1x32xf32> to vector<1x32xf32>
    %c3 = arith.constant 3 : index
    %c0_6 = arith.constant 0 : index
    %c0_7 = arith.constant 0 : index
    %6 = vector.load %arg2[%c3, %c0_6, %c0_7] : memref<9x1x32xf32, #tpu.memory_space<vmem>>, vector<1x1x32xf32>
    %7 = vector.shape_cast %6 : vector<1x1x32xf32> to vector<1x32xf32>
    %c4 = arith.constant 4 : index
    %c0_8 = arith.constant 0 : index
    %c0_9 = arith.constant 0 : index
    %8 = vector.load %arg2[%c4, %c0_8, %c0_9] : memref<9x1x32xf32, #tpu.memory_space<vmem>>, vector<1x1x32xf32>
    %9 = vector.shape_cast %8 : vector<1x1x32xf32> to vector<1x32xf32>
    %c5 = arith.constant 5 : index
    %c0_10 = arith.constant 0 : index
    %c0_11 = arith.constant 0 : index
    %10 = vector.load %arg2[%c5, %c0_10, %c0_11] : memref<9x1x32xf32, #tpu.memory_space<vmem>>, vector<1x1x32xf32>
    %11 = vector.shape_cast %10 : vector<1x1x32xf32> to vector<1x32xf32>
    %c6 = arith.constant 6 : index
    %c0_12 = arith.constant 0 : index
    %c0_13 = arith.constant 0 : index
    %12 = vector.load %arg2[%c6, %c0_12, %c0_13] : memref<9x1x32xf32, #tpu.memory_space<vmem>>, vector<1x1x32xf32>
    %13 = vector.shape_cast %12 : vector<1x1x32xf32> to vector<1x32xf32>
    %c7 = arith.constant 7 : index
    %c0_14 = arith.constant 0 : index
    %c0_15 = arith.constant 0 : index
    %14 = vector.load %arg2[%c7, %c0_14, %c0_15] : memref<9x1x32xf32, #tpu.memory_space<vmem>>, vector<1x1x32xf32>
    %15 = vector.shape_cast %14 : vector<1x1x32xf32> to vector<1x32xf32>
    %c8 = arith.constant 8 : index
    %c0_16 = arith.constant 0 : index
    %c0_17 = arith.constant 0 : index
    %16 = vector.load %arg2[%c8, %c0_16, %c0_17] : memref<9x1x32xf32, #tpu.memory_space<vmem>>, vector<1x1x32xf32>
    %17 = vector.shape_cast %16 : vector<1x1x32xf32> to vector<1x32xf32>
    %c0_18 = arith.constant 0 : index
    %c0_19 = arith.constant 0 : index
    %18 = vector.load %arg4[%c0_18, %c0_19] : memref<9x256xf32, #tpu.memory_space<vmem>>, vector<1x256xf32>
    %c1_20 = arith.constant 1 : index
    %c0_21 = arith.constant 0 : index
    %19 = vector.load %arg4[%c1_20, %c0_21] : memref<9x256xf32, #tpu.memory_space<vmem>>, vector<1x256xf32>
    %c2_22 = arith.constant 2 : index
    %c0_23 = arith.constant 0 : index
    %20 = vector.load %arg4[%c2_22, %c0_23] : memref<9x256xf32, #tpu.memory_space<vmem>>, vector<1x256xf32>
    %c3_24 = arith.constant 3 : index
    %c0_25 = arith.constant 0 : index
    %21 = vector.load %arg4[%c3_24, %c0_25] : memref<9x256xf32, #tpu.memory_space<vmem>>, vector<1x256xf32>
    %c4_26 = arith.constant 4 : index
    %c0_27 = arith.constant 0 : index
    %22 = vector.load %arg4[%c4_26, %c0_27] : memref<9x256xf32, #tpu.memory_space<vmem>>, vector<1x256xf32>
    %c5_28 = arith.constant 5 : index
    %c0_29 = arith.constant 0 : index
    %23 = vector.load %arg4[%c5_28, %c0_29] : memref<9x256xf32, #tpu.memory_space<vmem>>, vector<1x256xf32>
    %c6_30 = arith.constant 6 : index
    %c0_31 = arith.constant 0 : index
    %24 = vector.load %arg4[%c6_30, %c0_31] : memref<9x256xf32, #tpu.memory_space<vmem>>, vector<1x256xf32>
    %c7_32 = arith.constant 7 : index
    %c0_33 = arith.constant 0 : index
    %25 = vector.load %arg4[%c7_32, %c0_33] : memref<9x256xf32, #tpu.memory_space<vmem>>, vector<1x256xf32>
    %c8_34 = arith.constant 8 : index
    %c0_35 = arith.constant 0 : index
    %26 = vector.load %arg4[%c8_34, %c0_35] : memref<9x256xf32, #tpu.memory_space<vmem>>, vector<1x256xf32>
    %c0_36 = arith.constant 0 : index
    %c0_37 = arith.constant 0 : index
    %27 = vector.load %arg3[%c0_36, %c0_37] : memref<1x1xf32, #tpu.memory_space<vmem>>, vector<1x1xf32>
    %c0_i32 = arith.constant 0 : i32
    %c2_i32 = arith.constant 2 : i32
    %28 = arith.addi %c0_i32, %c2_i32 : i32
    %c1_i32 = arith.constant 1 : i32
    scf.for %arg6 = %c0_i32 to %28 step %c1_i32  : i32 {
      %29 = arith.index_cast %arg6 : i32 to index
      %c0_39 = arith.constant 0 : index
      %c0_40 = arith.constant 0 : index
      %30 = vector.load %arg1[%29, %c0_39, %c0_40] : memref<2x32x256xf32, #tpu.memory_space<vmem>>, vector<1x32x256xf32>
      %31 = vector.shape_cast %30 : vector<1x32x256xf32> to vector<32x256xf32>
      %cst = arith.constant 0.000000e+00 : f32
      %32 = vector.broadcast %cst : f32 to vector<1x256xf32>
      %cst_41 = arith.constant dense<0.000000e+00> : vector<1x256xf32>
      %33 = tpu.matmul %1, %31, %cst_41 {dimension_numbers = #tpu.dot_dimension_numbers<[1], [0], [0], [1], [0, 0, 1, 1], [], []>} : vector<1x32xf32>, vector<32x256xf32>, vector<1x256xf32> -> vector<1x256xf32>
      %c17_i32 = arith.constant 17 : i32
      %34 = tpu.dynamic_rotate %33 by %c17_i32 dim 1 : vector<1x256xf32>, i32 -> vector<1x256xf32>
      %35 = arith.mulf %34, %18 : vector<1x256xf32>
      %36 = arith.addf %32, %35 : vector<1x256xf32>
      %cst_42 = arith.constant dense<0.000000e+00> : vector<1x256xf32>
      %37 = tpu.matmul %3, %31, %cst_42 {dimension_numbers = #tpu.dot_dimension_numbers<[1], [0], [0], [1], [0, 0, 1, 1], [], []>} : vector<1x32xf32>, vector<32x256xf32>, vector<1x256xf32> -> vector<1x256xf32>
      %c16_i32 = arith.constant 16 : i32
      %38 = tpu.dynamic_rotate %37 by %c16_i32 dim 1 : vector<1x256xf32>, i32 -> vector<1x256xf32>
      %39 = arith.mulf %38, %19 : vector<1x256xf32>
      %40 = arith.addf %36, %39 : vector<1x256xf32>
      %cst_43 = arith.constant dense<0.000000e+00> : vector<1x256xf32>
      %41 = tpu.matmul %5, %31, %cst_43 {dimension_numbers = #tpu.dot_dimension_numbers<[1], [0], [0], [1], [0, 0, 1, 1], [], []>} : vector<1x32xf32>, vector<32x256xf32>, vector<1x256xf32> -> vector<1x256xf32>
      %c15_i32 = arith.constant 15 : i32
      %42 = tpu.dynamic_rotate %41 by %c15_i32 dim 1 : vector<1x256xf32>, i32 -> vector<1x256xf32>
      %43 = arith.mulf %42, %20 : vector<1x256xf32>
      %44 = arith.addf %40, %43 : vector<1x256xf32>
      %cst_44 = arith.constant dense<0.000000e+00> : vector<1x256xf32>
      %45 = tpu.matmul %7, %31, %cst_44 {dimension_numbers = #tpu.dot_dimension_numbers<[1], [0], [0], [1], [0, 0, 1, 1], [], []>} : vector<1x32xf32>, vector<32x256xf32>, vector<1x256xf32> -> vector<1x256xf32>
      %c1_i32_45 = arith.constant 1 : i32
      %46 = tpu.dynamic_rotate %45 by %c1_i32_45 dim 1 : vector<1x256xf32>, i32 -> vector<1x256xf32>
      %47 = arith.mulf %46, %21 : vector<1x256xf32>
      %48 = arith.addf %44, %47 : vector<1x256xf32>
      %cst_46 = arith.constant dense<0.000000e+00> : vector<1x256xf32>
      %49 = tpu.matmul %9, %31, %cst_46 {dimension_numbers = #tpu.dot_dimension_numbers<[1], [0], [0], [1], [0, 0, 1, 1], [], []>} : vector<1x32xf32>, vector<32x256xf32>, vector<1x256xf32> -> vector<1x256xf32>
      %50 = arith.mulf %49, %22 : vector<1x256xf32>
      %51 = arith.addf %48, %50 : vector<1x256xf32>
      %cst_47 = arith.constant dense<0.000000e+00> : vector<1x256xf32>
      %52 = tpu.matmul %11, %31, %cst_47 {dimension_numbers = #tpu.dot_dimension_numbers<[1], [0], [0], [1], [0, 0, 1, 1], [], []>} : vector<1x32xf32>, vector<32x256xf32>, vector<1x256xf32> -> vector<1x256xf32>
      %c255_i32 = arith.constant 255 : i32
      %53 = tpu.dynamic_rotate %52 by %c255_i32 dim 1 : vector<1x256xf32>, i32 -> vector<1x256xf32>
      %54 = arith.mulf %53, %23 : vector<1x256xf32>
      %55 = arith.addf %51, %54 : vector<1x256xf32>
      %cst_48 = arith.constant dense<0.000000e+00> : vector<1x256xf32>
      %56 = tpu.matmul %13, %31, %cst_48 {dimension_numbers = #tpu.dot_dimension_numbers<[1], [0], [0], [1], [0, 0, 1, 1], [], []>} : vector<1x32xf32>, vector<32x256xf32>, vector<1x256xf32> -> vector<1x256xf32>
      %c241_i32 = arith.constant 241 : i32
      %57 = tpu.dynamic_rotate %56 by %c241_i32 dim 1 : vector<1x256xf32>, i32 -> vector<1x256xf32>
      %58 = arith.mulf %57, %24 : vector<1x256xf32>
      %59 = arith.addf %55, %58 : vector<1x256xf32>
      %cst_49 = arith.constant dense<0.000000e+00> : vector<1x256xf32>
      %60 = tpu.matmul %15, %31, %cst_49 {dimension_numbers = #tpu.dot_dimension_numbers<[1], [0], [0], [1], [0, 0, 1, 1], [], []>} : vector<1x32xf32>, vector<32x256xf32>, vector<1x256xf32> -> vector<1x256xf32>
      %c240_i32 = arith.constant 240 : i32
      %61 = tpu.dynamic_rotate %60 by %c240_i32 dim 1 : vector<1x256xf32>, i32 -> vector<1x256xf32>
      %62 = arith.mulf %61, %25 : vector<1x256xf32>
      %63 = arith.addf %59, %62 : vector<1x256xf32>
      %cst_50 = arith.constant dense<0.000000e+00> : vector<1x256xf32>
      %64 = tpu.matmul %17, %31, %cst_50 {dimension_numbers = #tpu.dot_dimension_numbers<[1], [0], [0], [1], [0, 0, 1, 1], [], []>} : vector<1x32xf32>, vector<32x256xf32>, vector<1x256xf32> -> vector<1x256xf32>
      %c239_i32 = arith.constant 239 : i32
      %65 = tpu.dynamic_rotate %64 by %c239_i32 dim 1 : vector<1x256xf32>, i32 -> vector<1x256xf32>
      %66 = arith.mulf %65, %26 : vector<1x256xf32>
      %67 = arith.addf %63, %66 : vector<1x256xf32>
      %68 = vector.broadcast %27 : vector<1x1xf32> to vector<1x256xf32>
      %69 = arith.addf %67, %68 : vector<1x256xf32>
      %cst_51 = arith.constant 0.000000e+00 : f32
      %70 = vector.broadcast %cst_51 : f32 to vector<1x256xf32>
      %71 = arith.subf %70, %69 : vector<1x256xf32>
      %72 = math.exp %71 : vector<1x256xf32>
      %cst_52 = arith.constant 1.000000e+00 : f32
      %73 = vector.broadcast %cst_52 : f32 to vector<1x256xf32>
      %74 = arith.addf %73, %72 : vector<1x256xf32>
      %75 = tpu.reciprocal %74 {approx = true} : vector<1x256xf32> -> vector<1x256xf32>
      %cst_53 = arith.constant 5.000000e-01 : f32
      %76 = vector.broadcast %cst_53 : f32 to vector<1x256xf32>
      %77 = arith.subf %75, %76 : vector<1x256xf32>
      %cst_54 = arith.constant 3.000000e+00 : f32
      %78 = vector.broadcast %cst_54 : f32 to vector<1x256xf32>
      %79 = arith.mulf %78, %77 : vector<1x256xf32>
      %80 = arith.index_cast %arg6 : i32 to index
      %c0_55 = arith.constant 0 : index
      %c0_56 = arith.constant 0 : index
      %81 = vector.load %arg5[%80, %c0_55, %c0_56] : memref<2x1x256xf32, #tpu.memory_space<vmem>>, vector<1x1x256xf32>
      %82 = vector.shape_cast %81 : vector<1x1x256xf32> to vector<1x256xf32>
      %83 = vector.shape_cast %79 : vector<1x256xf32> to vector<1x1x256xf32>
      tpu.vector_store %arg5[%80, %c0_55, %c0_56], %83 {strides = array<i32>} : memref<2x1x256xf32, #tpu.memory_space<vmem>>, vector<1x1x256xf32>,
    }
    %c2_i32_38 = arith.constant 2 : i32
    return
  }
  func.func @transform_0(%arg0: i32) -> (i32, i32, i32) {
    %c0_i32 = arith.constant 0 : i32
    %c0_i32_0 = arith.constant 0 : i32
    %c0_i32_1 = arith.constant 0 : i32
    return %arg0, %c0_i32, %c0_i32_0 : i32, i32, i32
  }
  func.func @transform_1(%arg0: i32) -> (i32, i32, i32) {
    %c0_i32 = arith.constant 0 : i32
    %c0_i32_0 = arith.constant 0 : i32
    %c0_i32_1 = arith.constant 0 : i32
    %c0_i32_2 = arith.constant 0 : i32
    return %c0_i32, %c0_i32_0, %c0_i32_1 : i32, i32, i32
  }
  func.func @transform_2(%arg0: i32) -> (i32, i32) {
    %c0_i32 = arith.constant 0 : i32
    %c0_i32_0 = arith.constant 0 : i32
    %c0_i32_1 = arith.constant 0 : i32
    return %c0_i32, %c0_i32_0 : i32, i32
  }
  func.func @transform_3(%arg0: i32) -> (i32, i32) {
    %c0_i32 = arith.constant 0 : i32
    %c0_i32_0 = arith.constant 0 : i32
    %c0_i32_1 = arith.constant 0 : i32
    return %c0_i32, %c0_i32_0 : i32, i32
  }
  func.func @transform_4(%arg0: i32) -> (i32, i32, i32) {
    %c0_i32 = arith.constant 0 : i32
    %c0_i32_0 = arith.constant 0 : i32
    %c0_i32_1 = arith.constant 0 : i32
    return %arg0, %c0_i32, %c0_i32_0 : i32, i32, i32
  }
}

</mosaic_0001>

<bundles_post_ra>
// kernel: tpu_custom_call.1
= control target key start
LH: loop header
LB: loop body
LE: loop exit
PB: predicated region body
PF: predicated region fallthrough
CT: control target
= control target key end

     0   :  { %s1520_s0 = inlined_call_operand.hbm [shape: f32[2,32,256], index: 0, kind: input, shape index: {}]   ;;  %s1521_s1 = inlined_call_operand.hbm [shape: f32[9,1,32], index: 1, kind: input, shape index: {}]   ;;  %s1522_s2 = inlined_call_operand.<no memory space> [shape: f32[1,1], index: 2, kind: input, shape index: {}]   ;;  %s1523_s3 = inlined_call_operand.hbm [shape: f32[9,256], index: 3, kind: input, shape index: {}]   ;;  %s1524_s4 = inlined_call_operand.hbm [shape: f32[2,1,256], index: 4, kind: output, shape index: {}]  }
   0x1   :  { %v9_v0 = vstv %s1522_s2 }
   0x2   :  { %10 = vst [vmem:[#allocation2] sm:$0x1] %v9_v0 }
   0x3   :  { %11 = vsyncpa [#allocation4], 0 }
   0x4   :  { %12 = vsyncpa [#allocation7], 0 }
   0x5   :  { %13 = vsyncpa [#allocation5], 0  ;;  %s1276_s17 = smov [#allocation6]   ;;  %s1174_s21 = scalar_lea.hbm %s1521_s1, 144 }
   0x6   :  { %s31_s18 = sshll.u32 %s1276_s17, 4  ;;  %p1175_p0 = scmp.ne.s32.totalorder %s1521_s1, %s1174_s21  ;;  %s32_s18 = int_to_ptr.vmem [resolvable:$true] %s31_s18 }
   0x7   :  { %p1178_p1 = scmp.lt.u32.totalorder %s1174_s21, %s1521_s1 }
   0x9   :  { %p1180_p2 = pnand %p1178_p1, %p1175_p0 }
   0xb   :  { %1183 = shalt.err (!%p1180_p2)
}
   0xc   :  { %s1184_s2 = scalar_lea.vmem %s32_s18, 144  ;;  %s1188_s26 = scalar_lea.vmem %s32_s18, 160 }
   0xd   :  { %p1185_p3 = scmp.ne.s32.totalorder %s32_s18, %s1184_s2  ;;  %p1189_p4 = scmp.lt.s32.totalorder %s32_s18, %s32_s18 }
   0xe   :  { %p1190_p5 = scmp.lt.s32.totalorder %s1188_s26, %s1184_s2 }
  0x10   :  { %p1191_p6 = por %p1190_p5, %p1189_p4 }
  0x12   :  { %p1192_p7 = pnand %p1191_p6, %p1185_p3 }
  0x14   :  { %1195 = shalt.err (!%p1192_p7)
}
  0x15   :  { %s1277_s27 = smov 16   ;;  %s1278_s28 = smov 1  }
  0x16   :  { %37 = dma.hbm_to_vmem [thread:$0]  %s1521_s1, 144, %s32_s18, [#allocation7], %s1277_s27, %s1277_s27, %s1278_s28  }
  0x17   :  { %s1279_s5 = smov [#allocation3]   ;;  %s1196_s9 = scalar_lea.hbm %s1520_s0, 2048 }
  0x18   :  { %s19_s6 = sshll.u32 %s1279_s5, 4  ;;  %p1197_p8 = scmp.ne.s32.totalorder %s1520_s0, %s1196_s9  ;;  %s20_s6 = int_to_ptr.vmem [resolvable:$true] %s19_s6 }
  0x19   :  { %p1200_p9 = scmp.lt.u32.totalorder %s1196_s9, %s1520_s0 }
  0x1b   :  { %p1202_p10 = pnand %p1200_p9, %p1197_p8 }
  0x1d   :  { %1205 = shalt.err (!%p1202_p10)
}
  0x1e   :  { %s1206_s14 = scalar_lea.vmem %s20_s6, 2048  ;;  %p1211_p12 = scmp.lt.s32.totalorder %s20_s6, %s20_s6 }
  0x1f   :  { %p1207_p11 = scmp.ne.s32.totalorder %s20_s6, %s1206_s14  ;;  %p1212_p13 = scmp.lt.s32.totalorder %s1206_s14, %s1206_s14 }
  0x21   :  { %p1213_p0 = por %p1212_p13, %p1211_p12 }
  0x23   :  { %p1214_p1 = pnand %p1213_p0, %p1207_p11 }
  0x25   :  { %1217 = shalt.err (!%p1214_p1)
}
  0x26   :  { %s1280_s1 = smov 256   ;;  %s1281_s17 = smov [#allocation8]  }
  0x27   :  { %25 = dma.hbm_to_vmem [thread:$0]  %s1520_s0, 2048, %s20_s6, [#allocation4], %s1280_s1, %s1280_s1, %s1277_s27  }
  0x28   :  { %s45_s18 = sshll.u32 %s1281_s17, 4  ;;  %s1218_s21 = scalar_lea.hbm %s1523_s3, 512  ;;  %s46_s18 = int_to_ptr.vmem [resolvable:$true] %s45_s18 }
  0x29   :  { %p1219_p2 = scmp.ne.s32.totalorder %s1523_s3, %s1218_s21  ;;  %p1222_p3 = scmp.lt.u32.totalorder %s1218_s21, %s1523_s3 }
  0x2b   :  { %p1224_p4 = pnand %p1222_p3, %p1219_p2 }
  0x2d   :  { %1227 = shalt.err (!%p1224_p4)
}
  0x2e   :  { %s1228_s2 = scalar_lea.vmem %s46_s18, 512  ;;  %p1233_p6 = scmp.lt.s32.totalorder %s46_s18, %s46_s18 }
  0x2f   :  { %p1229_p5 = scmp.ne.s32.totalorder %s46_s18, %s1228_s2  ;;  %p1234_p7 = scmp.lt.s32.totalorder %s1228_s2, %s1228_s2 }
  0x31   :  { %p1235_p8 = por %p1234_p7, %p1233_p6 }
  0x33   :  { %p1236_p9 = pnand %p1235_p8, %p1229_p5 }
  0x35   :  { %1239 = shalt.err (!%p1236_p9)
}
  0x36   :  { %51 = dma.hbm_to_vmem [thread:$0]  %s1523_s3, 512, %s46_s18, [#allocation7], %s1280_s1, %s1280_s1, %s1277_s27  }
  0x37   :  { %1266 = dma.done.wait [#allocation4], 2048  }
  0x38   :  { %1267 = vsyncadd [#allocation4], 4294965248 }
  0x39   :  { %1268 = dma.done.wait [#allocation7], 656  }
  0x3a   :  { %1269 = vsyncadd [#allocation7], 4294966640  ;;  %v1364_v1 = vld [vmem:[#allocation6] sm:$0x1]  ;;  %v1366_v2 = vld [vmem:[#allocation6 + $0x1] sm:$0x1] }
  0x3b   :  { %v1368_v3 = vld [vmem:[#allocation6 + $0x2] sm:$0x1]  ;;  %v1370_v4 = vld [vmem:[#allocation6 + $0x3] sm:$0x1]  ;;  %v1372_v5 = vld [vmem:[#allocation6 + $0x4] sm:$0x1] }
  0x3c   :  { %v1374_v6 = vld [vmem:[#allocation6 + $0x5] sm:$0x1]  ;;  %v1376_v7 = vld [vmem:[#allocation6 + $0x6] sm:$0x1]  ;;  %v1378_v8 = vld [vmem:[#allocation6 + $0x7] sm:$0x1] }
  0x3d   :  { %v1380_v9 = vld [vmem:[#allocation6 + $0x8] sm:$0x1]  ;;  %v1382_v10 = vld [vmem:[#allocation8] ss:$8 sm:$0x3]  ;;  %s1402_s3 = smov 0  }
  0x3e   :  { %v1384_v11 = vld [vmem:[#allocation8 + $0x1] ss:$8 sm:$0x3]  ;;  %v1386_v12 = vld [vmem:[#allocation8 + $0x2] ss:$8 sm:$0x3] }
  0x3f   :  { %v1388_v13 = vld [vmem:[#allocation8 + $0x3] ss:$8 sm:$0x3]  ;;  %v1390_v14 = vld [vmem:[#allocation8 + $0x4] ss:$8 sm:$0x3] }
  0x40   :  { %v1392_v15 = vld [vmem:[#allocation8 + $0x5] ss:$8 sm:$0x3]  ;;  %v1394_v16 = vld [vmem:[#allocation8 + $0x6] ss:$8 sm:$0x3] }
  0x41   :  { %v1396_v17 = vld [vmem:[#allocation8 + $0x7] ss:$8 sm:$0x3]  ;;  %v1398_v18 = vld [vmem:[#allocation8 + $0x10] ss:$8 sm:$0x3] }
  0x42   :  { %v1400_v19 = vld [vmem:[#allocation2] sm:$0x1] }
  0x43 LB: > { %v1282_v20 = vmov 0.0   ;;  %s1064_s27 = sshll.u32 %s1274_s3, 6  ;;  %v1283_v21 = vmov 0   ;;  %vm113_vm0 = vcmask 261120   ;;  %s1284_s29 = smov 16   ;;  %v192_v55 = vlaneseq  ;;  %s1274_s3 = sphi %s1402_s3, %s101_s3  }
  0x44   : > { %181 = vmatprep.mubr.f32.mxu0 %v1282_v20  ;;  %279 = vmatprep.mubr.f32.mxu1 %v1282_v20  ;;  %s104_s28 = scalar_lea.vmem [#allocation3], %s1064_s27  ;;  %s1285_s30 = smov 17  }
  0x45   : > { %1165 = vset.pattern.permute.xlu0 %v1283_v21  ;;  %v106_v22 = vld [vmem:[%s104_s28 + $0x8] sm:$0xff]  ;;  %v108_v23 = vld [vmem:[%s104_s28 + $0x18] sm:$0xff]  ;;  %v105_v24 = vld [vmem:[%s104_s28] sm:$0xff]  ;;  %s1286_s5 = smov 15   ;;  %s1287_s6 = smov 1   ;;  %v1443_v58 = vshrl.u32 %v192_v55, 7 }
  0x46   : > { %975 = vperm.xlu0 %1165, %v1400_v19   ;;  %v1065_v25 = vpack.c.bf16 %v108_v23, %v106_v22  ;;  %v107_v26 = vld [vmem:[%s104_s28 + $0x10] sm:$0xff]  ;;  %v110_v27 = vld [vmem:[%s104_s28 + $0x28] sm:$0xff]  ;;  %v112_v28 = vld [vmem:[%s104_s28 + $0x38] sm:$0xff]  ;;  %s1288_s7 = smov 127   ;;  %s1289_s8 = smov 112   ;;  %v1446_v59 = vand.u32 127, %v192_v55 }
  0x47   : > { %v1067_v29 = vpack.c.bf16 %v107_v26, %v105_v24  ;;  %v1069_v30 = vpack.c.bf16 %v112_v28, %v110_v27  ;;  %v109_v31 = vld [vmem:[%s104_s28 + $0x20] sm:$0xff]  ;;  %v111_v32 = vld [vmem:[%s104_s28 + $0x30] sm:$0xff]  ;;  %s1290_s9 = smov 113   ;;  %s1291_s10 = smov 111   ;;  %v1449_v62 = vsub.s32 0, %v1443_v58  ;;  %v1452_v63 = vsub.s32 1, %v1443_v58 }
  0x48   : > { %1066 = vmatprep.subr.bf16.mxu0 %v1065_v25  ;;  %1074 = vmatprep.subr.bf16.mxu1 %v1065_v25  ;;  %v1071_v33 = vpack.c.bf16 %v111_v32, %v109_v31  ;;  %vm290_vm1 = vcmp.lt.s32.totalorder %v1446_v59, 16  ;;  %vm194_vm2 = vcmp.lt.s32.totalorder %v1446_v59, 17  ;;  %vm386_vm3 = vcmp.lt.s32.totalorder %v1446_v59, 15  ;;  %s1063_s11 = sshll.u32 %s1274_s3, 1  ;;  %s101_s3 = sadd.s32 1, %s1274_s3  }
  0x49   : > { %1068 = vmatpush1.bf16.msra.mxu0 %v1067_v29  ;;  %1076 = vmatpush1.bf16.msra.mxu1 %v1067_v29  ;;  %v297_v0 = vrot.slane %v1384_v11, %v1449_v62  ;;  %v201_v21 = vrot.slane %v1382_v10, %v1449_v62  ;;  %v205_v22 = vrot.slane %v1382_v10, %v1452_v63  ;;  %vm482_vm4 = vcmp.lt.s32.totalorder %v1446_v59, 1  ;;  %s1017_s12 = scalar_lea.vmem [#allocation9], %s1063_s11  ;;  %p98_p10 = scmp.ge.s32.totalorder %s101_s3, 2  }
  0x4a   : > { %1070 = vmatprep.subr.bf16.mxu0 %v1069_v30  ;;  %1078 = vmatprep.subr.bf16.mxu1 %v1069_v30  ;;  %v393_v28 = vrot.slane %v1386_v12, %v1449_v62  ;;  %vm667_vm5 = vcmp.lt.s32.totalorder %v1446_v59, 127  ;;  %vm763_vm6 = vcmp.lt.s32.totalorder %v1446_v59, 113  ;;  %vm859_vm7 = vcmp.lt.s32.totalorder %v1446_v59, 112  ;;  %s1293_s13 = smov (%p98_p10), [#allocation9]  }
  0x4b   : > { %vm955_vm8 = vcmp.lt.s32.totalorder %v1446_v59, 111  ;;  %vm1020_vm9 = vcmp.lt.s32.totalorder %v192_v55, 256  ;;  %s1028_s14 = sshll.u32 (%p98_p10), %s1293_s13, 4  ;;  %s1029_s14 = int_to_ptr.vmem [resolvable:$true] %s1028_s14 }
  0x4c   :  { %s1240_s1 = scalar_lea.vmem (%p98_p10), %s1029_s14, 64  ;;  %p1245_p12 = scmp.lt.s32.totalorder (%p98_p10), %s1029_s14, %s1029_s14 }
  0x4d   : > { %1072 = vmatpush1.bf16.msra.mxu0 %v1071_v33  ;;  %1080 = vmatpush1.bf16.msra.mxu1 %v1071_v33  ;;  %p1241_p11 = scmp.ne.s32.totalorder (%p98_p10), %s1029_s14, %s1240_s1  ;;  %p1246_p13 = scmp.lt.s32.totalorder (%p98_p10), %s1240_s1, %s1240_s1 }
  0x4e   : > { %1082 = vmatprep.subr.bf16.mxu0 %v1065_v25  ;;  %1090 = vmatprep.subr.bf16.mxu1 %v1065_v25 }
  0x4f   :  { %p1247_p0 = por (%p98_p10), %p1246_p13, %p1245_p12 }
  0x50   : > { %1052 = vmatmul.mubr.msk.f32.vlgmr.msra.gmra.mrb[0].mxu0 %vm113_vm0, %v1364_v1  ;;  %1053 = vmatmul.mubr.msk.f32.vlgmr.msra.gmra.mrb[0].mxu1 %vm113_vm0, %v1366_v2 }
  0x51   : > { %1084 = vmatpush1.bf16.msra.mxu0 %v1067_v29  ;;  %1092 = vmatpush1.bf16.msra.mxu1 %v1067_v29  ;;  %p1248_p1 = pnand (%p98_p10), %p1247_p0, %p1241_p11 }
  0x52   : > { %1086 = vmatprep.subr.bf16.mxu0 %v1069_v30  ;;  %1094 = vmatprep.subr.bf16.mxu1 %v1069_v30 }
  0x53   : > { %375 = vmatprep.mubr.f32.mxu0 %v1282_v20  ;;  %471 = vmatprep.mubr.f32.mxu1 %v1282_v20 }
  0x55   : > { %1088 = vmatpush1.bf16.msra.mxu0 %v1071_v33  ;;  %1096 = vmatpush1.bf16.msra.mxu1 %v1071_v33 }
  0x56   : > { %1106 = vmatprep.subr.bf16.mxu1 %v1065_v25  ;;  %1098 = vmatprep.subr.bf16.mxu0 %v1065_v25 }
  0x58   : > { %1054 = vmatmul.mubr.msk.f32.vlgmr.msra.gmra.mrb[2].mxu0 %vm113_vm0, %v1368_v3  ;;  %1055 = vmatmul.mubr.msk.f32.vlgmr.msra.gmra.mrb[2].mxu1 %vm113_vm0, %v1370_v4 }
  0x59   : > { %1108 = vmatpush1.bf16.msra.mxu1 %v1067_v29  ;;  %1100 = vmatpush1.bf16.msra.mxu0 %v1067_v29 }
  0x5a   : > { %1110 = vmatprep.subr.bf16.mxu1 %v1069_v30  ;;  %1102 = vmatprep.subr.bf16.mxu0 %v1069_v30 }
  0x5b   : > { %656 = vmatprep.mubr.f32.mxu1 %v1282_v20  ;;  %567 = vmatprep.mubr.f32.mxu0 %v1282_v20 }
  0x5d   : > { %1112 = vmatpush1.bf16.msra.mxu1 %v1071_v33  ;;  %1104 = vmatpush1.bf16.msra.mxu0 %v1071_v33 }
  0x5e   : > { %1122 = vmatprep.subr.bf16.mxu1 %v1065_v25  ;;  %1114 = vmatprep.subr.bf16.mxu0 %v1065_v25 }
  0x60   : > { %1057 = vmatmul.mubr.msk.f32.vlgmr.msra.gmra.mrb[4].mxu1 %vm113_vm0, %v1374_v6  ;;  %1056 = vmatmul.mubr.msk.f32.vlgmr.msra.gmra.mrb[4].mxu0 %vm113_vm0, %v1372_v5 }
  0x61   : > { %1124 = vmatpush1.bf16.msra.mxu1 %v1067_v29  ;;  %1116 = vmatpush1.bf16.msra.mxu0 %v1067_v29 }
  0x62   : > { %1126 = vmatprep.subr.bf16.mxu1 %v1069_v30  ;;  %1118 = vmatprep.subr.bf16.mxu0 %v1069_v30 }
  0x63   : > { %848 = vmatprep.mubr.f32.mxu1 %v1282_v20  ;;  %752 = vmatprep.mubr.f32.mxu0 %v1282_v20 }
  0x65   : > { %1128 = vmatpush1.bf16.msra.mxu1 %v1071_v33  ;;  %1120 = vmatpush1.bf16.msra.mxu0 %v1071_v33 }
  0x66   : > { %1130 = vmatprep.subr.bf16.mxu0 %v1065_v25 }
  0x68   : > { %1059 = vmatmul.mubr.msk.f32.vlgmr.msra.gmra.mrb[6].mxu1 %vm113_vm0, %v1378_v8  ;;  %1058 = vmatmul.mubr.msk.f32.vlgmr.msra.gmra.mrb[6].mxu0 %vm113_vm0, %v1376_v7 }
  0x69   : > { %1132 = vmatpush1.bf16.msra.mxu0 %v1067_v29  ;;  %944 = vmatprep.mubr.f32.mxu0 %v1282_v20  ;;  %v301_v20 = vrot.slane %v1384_v11, %v1452_v63  ;;  %v397_v29 = vrot.slane %v1386_v12, %v1452_v63 }
  0x6a   : > { %1134 = vmatprep.subr.bf16.mxu0 %v1069_v30 }
  0x6d   : > { %1136 = vmatpush1.bf16.msra.mxu0 %v1071_v33  ;;  %v489_v33 = vrot.slane %v1388_v13, %v1449_v62 }
  0x70   : > { %1060 = vmatmul.mubr.msk.f32.vlgmr.msra.gmra.mrb[8].mxu0 %vm113_vm0, %v1380_v9 }
  0xc5   : > { %v1440_v52 = vpop.permute.xlu0 %975 }
 0x123   : > { %v183_v34 = vpop.f32.mrb[0].mxu0  ;;  %v281_v35 = vpop.f32.mrb[0].mxu1 }
 0x124   : > { %286 = vrot.lane.b32.xlu1 %v281_v35, %s1284_s29  ;;  %v283_v36 = vpop.f32.mrb[1].mxu1  ;;  %188 = vrot.lane.b32.xlu0 %v183_v34, %s1285_s30  ;;  %v185_v37 = vpop.f32.mrb[1].mxu0  ;;  %v493_v34 = vrot.slane %v1388_v13, %v1452_v63 }
 0x128   : > { %288 = vrot.lane.b32.xlu1 %v283_v36, %s1284_s29  ;;  %190 = vrot.lane.b32.xlu0 %v185_v37, %s1285_s30 }
 0x12b   : > { %v377_v38 = vpop.f32.mrb[2].mxu0  ;;  %v473_v39 = vpop.f32.mrb[2].mxu1 }
 0x12c   : > { %v475_v40 = vpop.f32.mrb[3].mxu1  ;;  %382 = vrot.lane.b32.xlu0 %v377_v38, %s1286_s5  ;;  %v379_v41 = vpop.f32.mrb[3].mxu0 }
 0x12d   : > { %384 = vrot.lane.b32.xlu1 %v379_v41, %s1286_s5 }
 0x130   : > { %478 = vrot.lane.b32.xlu0 %v473_v39, %s1287_s6 }
 0x131   : > { %480 = vrot.lane.b32.xlu1 %v475_v40, %s1287_s6 }
 0x133   : > { %v658_v42 = vpop.f32.mrb[4].mxu1  ;;  %v1436_v43 = vpop.f32.mrb[4].mxu0 }
 0x134   : > { %v660_v44 = vpop.f32.mrb[5].mxu1  ;;  %663 = vrot.lane.b32.xlu0 %v658_v42, %s1288_s7  ;;  %v1438_v45 = vpop.f32.mrb[5].mxu0 }
 0x135   : > { %665 = vrot.lane.b32.xlu1 %v660_v44, %s1288_s7 }
 0x13b   : > { %v850_v46 = vpop.f32.mrb[6].mxu1  ;;  %v754_v47 = vpop.f32.mrb[6].mxu0 }
 0x13c   : > { %v852_v48 = vpop.f32.mrb[7].mxu1  ;;  %855 = vrot.lane.b32.xlu1 %v850_v46, %s1289_s8  ;;  %v756_v49 = vpop.f32.mrb[7].mxu0  ;;  %759 = vrot.lane.b32.xlu0 %v754_v47, %s1290_s9 }
 0x140   : > { %761 = vrot.lane.b32.xlu1 %v756_v49, %s1290_s9 }
 0x143   : > { %v946_v50 = vpop.f32.mrb[8].mxu0 }
 0x144   : > { %857 = vrot.lane.b32.xlu1 %v852_v48, %s1289_s8  ;;  %v948_v51 = vpop.f32.mrb[9].mxu0  ;;  %951 = vrot.lane.b32.xlu0 %v946_v50, %s1291_s10 }
 0x148   : > { %953 = vrot.lane.b32.xlu1 %v948_v51, %s1291_s10  ;;  %v578_v51 = vrot.slane %v1390_v14, %v1449_v62 }
 0x196   : > { %v287_v53 = vpop.permute.xlu1 %286  ;;  %v189_v54 = vpop.permute.xlu0 %188 }
 0x19a   : > { %v289_v56 = vpop.permute.xlu1 %288  ;;  %v191_v57 = vpop.permute.xlu0 %190 }
 0x19b   : > { %v291_v24 = vsel %vm290_vm1, %v287_v53, %v289_v56  ;;  %v292_v25 = vsel %vm290_vm1, %v289_v56, %v287_v53  ;;  %v195_v26 = vsel %vm194_vm2, %v189_v54, %v191_v57  ;;  %v196_v27 = vsel %vm194_vm2, %v191_v57, %v189_v54 }
 0x19c   : > { %v304_v35 = vmul.f32 %v297_v0, %v292_v25  ;;  %v305_v36 = vmul.f32 %v301_v20, %v291_v24  ;;  %v208_v37 = vmul.f32 %v201_v21, %v196_v27  ;;  %v209_v38 = vmul.f32 %v205_v22, %v195_v26 }
 0x19d   : > { %v582_v53 = vrot.slane %v1390_v14, %v1452_v63  ;;  %v678_v20 = vrot.slane %v1392_v15, %v1452_v63  ;;  %v770_v24 = vrot.slane %v1394_v16, %v1449_v62  ;;  %v585_v25 = vmul.f32 %v578_v51, %v1436_v43 }
 0x19e   : > { %v383_v61 = vpop.permute.xlu0 %382  ;;  %v306_v46 = vadd.f32 %v304_v35, %v208_v37  ;;  %v307_v47 = vadd.f32 %v305_v36, %v209_v38  ;;  %v774_v27 = vrot.slane %v1394_v16, %v1452_v63 }
 0x19f   : > { %v385_v60 = vpop.permute.xlu1 %384  ;;  %v586_v26 = vmul.f32 %v582_v53, %v1438_v45 }
 0x1a0   : > { %v387_v31 = vsel %vm386_vm3, %v383_v61, %v385_v60  ;;  %v388_v32 = vsel %vm386_vm3, %v385_v60, %v383_v61  ;;  %v674_v60 = vrot.slane %v1392_v15, %v1449_v62 }
 0x1a1   : > { %v400_v41 = vmul.f32 %v393_v28, %v388_v32  ;;  %v401_v42 = vmul.f32 %v397_v29, %v387_v31  ;;  %v866_v31 = vrot.slane %v1396_v17, %v1449_v62  ;;  %v870_v32 = vrot.slane %v1396_v17, %v1452_v63 }
 0x1a2   : > { %v479_v30 = vpop.permute.xlu0 %478 }
 0x1a3   : > { %v481_v23 = vpop.permute.xlu1 %480  ;;  %v402_v54 = vadd.f32 %v400_v41, %v306_v46  ;;  %v403_v56 = vadd.f32 %v401_v42, %v307_v47  ;;  %v966_v41 = vrot.slane %v1398_v18, %v1452_v63 }
 0x1a4   : > { %v483_v39 = vsel %vm482_vm4, %v479_v30, %v481_v23  ;;  %v484_v40 = vsel %vm482_vm4, %v481_v23, %v479_v30 }
 0x1a5   : > { %v496_v48 = vmul.f32 %v489_v33, %v484_v40  ;;  %v497_v49 = vmul.f32 %v493_v34, %v483_v39  ;;  %v962_v40 = vrot.slane %v1398_v18, %v1449_v62 }
 0x1a6   : > { %v664_v50 = vpop.permute.xlu0 %663 }
 0x1a7   : > { %v666_v44 = vpop.permute.xlu1 %665  ;;  %v498_v61 = vadd.f32 %v496_v48, %v402_v54  ;;  %v499_v0 = vadd.f32 %v497_v49, %v403_v56 }
 0x1a8   : > { %v668_v22 = vsel %vm667_vm5, %v664_v50, %v666_v44  ;;  %v669_v23 = vsel %vm667_vm5, %v666_v44, %v664_v50 }
 0x1a9   : > { %v587_v33 = vadd.f32 %v585_v25, %v498_v61  ;;  %v588_v34 = vadd.f32 %v586_v26, %v499_v0  ;;  %v681_v35 = vmul.f32 %v674_v60, %v668_v22  ;;  %v682_v43 = vmul.f32 %v678_v20, %v669_v23 }
 0x1aa   : > { %v981_v61 = vrot.slane %v1440_v52, %v1449_v62 }
 0x1ab   : > { %v683_v42 = vadd.f32 %v681_v35, %v587_v33  ;;  %v684_v44 = vadd.f32 %v682_v43, %v588_v34 }
 0x1ae   : > { %v856_v57 = vpop.permute.xlu1 %855  ;;  %v760_v21 = vpop.permute.xlu0 %759 }
 0x1b2   : > { %v762_v28 = vpop.permute.xlu1 %761 }
 0x1b3   : > { %v764_v29 = vsel %vm763_vm6, %v760_v21, %v762_v28  ;;  %v765_v30 = vsel %vm763_vm6, %v762_v28, %v760_v21 }
 0x1b4   : > { %v777_v36 = vmul.f32 %v770_v24, %v764_v29  ;;  %v778_v45 = vmul.f32 %v774_v27, %v765_v30  ;;  %v1292_v30 = vmov 1966171168  }
 0x1b6   : > { %v858_v37 = vpop.permute.xlu1 %857  ;;  %v952_v48 = vpop.permute.xlu0 %951  ;;  %v779_v49 = vadd.f32 %v777_v36, %v683_v42  ;;  %v780_v50 = vadd.f32 %v778_v45, %v684_v44 }
 0x1b7   : > { %v860_v38 = vsel %vm859_vm7, %v856_v57, %v858_v37  ;;  %v861_v39 = vsel %vm859_vm7, %v858_v37, %v856_v57 }
 0x1b8   : > { %v873_v46 = vmul.f32 %v866_v31, %v860_v38  ;;  %v874_v47 = vmul.f32 %v870_v32, %v861_v39  ;;  %v1002_v31 = vunpack.c.l.s4 %v1292_v30 }
 0x1ba   : > { %v954_v51 = vpop.permute.xlu1 %953  ;;  %v875_v56 = vadd.f32 %v873_v46, %v779_v49  ;;  %v876_v59 = vadd.f32 %v874_v47, %v780_v50  ;;  %v1003_v62 = vunpack.c.0.s8 %v1002_v31 }
 0x1bb   : > { %v956_v53 = vsel %vm955_vm8, %v952_v48, %v954_v51  ;;  %v957_v54 = vsel %vm955_vm8, %v954_v51, %v952_v48 }
 0x1bc   : > { %v969_v60 = vmul.f32 %v962_v40, %v956_v53  ;;  %v970_v57 = vmul.f32 %v966_v41, %v957_v54  ;;  %v1006_v43 = vsub.s32 %v1003_v62, %v1443_v58 }
 0x1be   : > { %v971_v0 = vadd.f32 %v969_v60, %v875_v56  ;;  %v972_v20 = vadd.f32 %v970_v57, %v876_v59 }
 0x1c0   : > { %v982_v63 = vadd.f32 %v981_v61, %v971_v0  ;;  %v983_v21 = vadd.f32 %v981_v61, %v972_v20 }
 0x1c2   : > { %v984_v22 = vsub.f32 0.0, %v982_v63  ;;  %v985_v23 = vsub.f32 0.0, %v983_v21 }
 0x1c4   : > { %v986_v24 = vmul.f32 1.442695, %v984_v22  ;;  %v988_v25 = vmul.f32 1.442695, %v985_v23 }
 0x1c6   : > { %1166 = vpow2.f32 %v986_v24 }
 0x1c7   : > { %1168 = vpow2.f32 %v988_v25 }
 0x1d0   : > { %v1167_v26 = vpop.eup %1166 }
 0x1d1   : > { %v1169_v27 = vpop.eup %1168  ;;  %v990_v28 = vadd.f32 1.0, %v1167_v26 }
 0x1d2   : > { %v991_v29 = vadd.f32 1.0, %v1169_v27 }
 0x1d3   : > { %1170 = vrcp.f32 %v990_v28 }
 0x1d4   : > { %1172 = vrcp.f32 %v991_v29 }
 0x1dd   : > { %v1171_v52 = vpop.eup %1170 }
 0x1de   : > { %v1173_v32 = vpop.eup %1172  ;;  %v1061_v33 = vadd.f32 -0.5, %v1171_v52 }
 0x1df   : > { %v1062_v34 = vadd.f32 -0.5, %v1173_v32 }
 0x1e0   : > { %v996_v35 = vmul.f32 3.0, %v1061_v33 }
 0x1e1   : > { %v997_v36 = vmul.f32 3.0, %v1062_v34 }
 0x1e3   : > { %v1000_v45 = vcombine.low %v996_v35, %v997_v36  ;;  %100 = sbr.rel (!%p98_p10) target bundleno = 67 (0x43), region = 73 }
 0x1e5   : > { %v1007_v37 = vrot.slane %v1000_v45, %v1006_v43 }
 0x1e7   : > { %v1014_v38 = vrot.slane %v1007_v37, %v1006_v43 }
 0x1e9   : > { %1022 = vst.msk [vmem:[%s1017_s12] sm:$0x3] %vm1020_vm9, %v1014_v38 }
 0x1ea   :  { %1251 = shalt.err (!%p1248_p1)
}
 0x1eb   :  { %s1252_s17 = scalar_lea.hbm %s1524_s4, 64 }
 0x1ec   :  { %p1253_p2 = scmp.ne.s32.totalorder %s1524_s4, %s1252_s17  ;;  %p1256_p3 = scmp.lt.u32.totalorder %s1252_s17, %s1524_s4 }
 0x1ee   :  { %p1258_p4 = pnand %p1256_p3, %p1253_p2 }
 0x1f0   :  { %1261 = shalt.err (!%p1258_p4)
}
 0x1f1   :  { %s1294_s22 = smov 32   ;;  %s1295_s23 = smov 2  }
 0x1f2   :  { %1034 = dma.vmem_to_hbm [thread:$0]  %s1029_s14, 64, %s1524_s4, [#allocation5], %s1294_s22, %s1294_s22, %s1295_s23  }
 0x1f3   :  { %1270 = dma.done.wait [#allocation5], 64  }
 0x1f4   :  { %1271 = vsyncadd [#allocation5], 4294967232 }
 0x1f5   :  { %1038 = vsyncpa [#allocation4], 1 }
 0x1f6   :  { %1039 = vsyncpa [#allocation7], 1 }
 0x1f7   :  { %1040 = vsyncpa [#allocation5], 1 }

</bundles_post_ra>
